<compile_context>
chip_gen: v5e
topology: v5e:2x2
jax: 0.10.0
libtpu: 0.0.40
codegen_flags: <defaults>
</compile_context>

<pallas_src>
import math

import jax
import jax.numpy as jnp
from jax.experimental import pallas as pl
from jax.experimental.pallas import tpu as pltpu

_BLOCK_BUDGET_BYTES = 4 * 1024 * 1024   # per-input VMEM block target
_VMEM_LIMIT_BYTES = 32 * 1024 * 1024    # explicit scoped-VMEM limit (safe on v5e/v6e/v7x)


def _glu_kernel(a_ref, b_ref, o_ref):
    # Pure VPU + EUP elementwise hot path: no in-kernel slicing, no lane shuffles.
    a = a_ref[...].astype(jnp.float32)
    b = b_ref[...].astype(jnp.float32)
    sig = 0.5 * jnp.tanh(0.5 * b) + 0.5          # sigmoid via one EUP op, no divide
    o_ref[...] = (a * sig).astype(o_ref.dtype)


def _cdiv(a, b):
    return -(-a // b)


def _round_up(a, b):
    return _cdiv(a, b) * b


def _sublane_pack(dtype):
    # Rows per sublane tile: 8 for 32-bit, 16 for bf16/f16, 32 for int8/fp8.
    return max(8, 32 // jnp.dtype(dtype).itemsize)


def _pick_col_tile(C, itemsize, pack, budget):
    """Largest multiple-of-128 divisor of C whose sublane-padded block fits budget."""
    if C * itemsize * pack <= budget:
        return C
    d = C // 128
    m_cap = max(1, min(d, budget // (128 * itemsize * pack)))
    for m in range(m_cap, 0, -1):
        if d % m == 0:
            return 128 * m
    return 128


def _pick_row_tile(pre, tc, itemsize, pack, budget):
    """Sublane-aligned row tile; keep >= 2 (preferably even) grid steps for v7x megacore."""
    if pre <= pack:
        return pre                                # full-extent rows (block constraint OK)
    tm = max(pack, (budget // (tc * itemsize)) // pack * pack)
    tm = min(tm, _round_up(pre, pack))
    steps = _cdiv(pre, tm)
    if steps == 1:                                # a 1-step "parallel" grid idles one v7x TC
        tm = max(pack, (tm // 2) // pack * pack)
        steps = _cdiv(pre, tm)
    if steps % 2 == 1 and 3 <= steps <= 9:        # small odd step count -> try an even one
        cand = _round_up(_cdiv(pre, steps + 1), pack)
        if cand >= pack and _cdiv(pre, cand) % 2 == 0:
            tm = cand
    return tm


def glu(x, dim: int = -1):
    """torch.nn.functional.glu semantics: a, b = chunk(x, 2, dim); y = a * sigmoid(b)."""
    ndim = x.ndim
    dim = dim % ndim
    two_h = x.shape[dim]
    if two_h % 2 != 0:
        raise ValueError("GLU requires an even size along the split dimension")
    H = two_h // 2
    pre = math.prod(x.shape[:dim])                # elements before the split dim
    post = math.prod(x.shape[dim + 1:])           # elements after the split dim
    C = H * post                                  # contiguous per-half chunk per pre-index
    out_shape = x.shape[:dim] + (H,) + x.shape[dim + 1:]

    if C == 0 or pre == 0 or C % 128 != 0:
        # Lane-unaligned / degenerate sizes: XLA's own elementwise codegen beats a
        # masked, unpipelined Pallas block here (perf review item 3).
        a, b = jnp.split(x, 2, axis=dim)
        return a * jax.nn.sigmoid(b)

    # Free, contiguous reshape -- no HBM copy (unlike jnp.split).
    # Row-major layout guarantees: for each pre-index, columns [0, C) are the
    # `a` half and columns [C, 2C) are the `b` half.
    x2 = x.reshape(pre, 2 * C)
    itemsize = jnp.dtype(x.dtype).itemsize
    pack = _sublane_pack(x.dtype)

    tc = _pick_col_tile(C, itemsize, pack, _BLOCK_BUDGET_BYTES)
    tm = _pick_row_tile(pre, tc, itemsize, pack, _BLOCK_BUDGET_BYTES)
    gr = _cdiv(pre, tm)                           # partial edge row-block handled by Pallas
    gc = C // tc                                  # tc divides C exactly (no partial columns)
    if gr * gc == 1 and C % 256 == 0:
        # Still a single block (tiny `pre`): split the columns so both v7x
        # TensorCores get work.
        tc = C // 2
        gc = 2
    b_off = C // tc                               # b half starts at column block C // tc

    def _a_map(i, j):
        return (i, j)

    def _b_map(i, j):
        return (i, j + b_off)

    out2 = pl.pallas_call(
        _glu_kernel,
        out_shape=jax.ShapeDtypeStruct((pre, C), x.dtype),
        grid=(gr, gc),
        in_specs=[
            pl.BlockSpec((tm, tc), _a_map),       # a half of x2
            pl.BlockSpec((tm, tc), _b_map),       # b half of x2 (column-block offset)
        ],
        out_specs=pl.BlockSpec((tm, tc), _a_map),
        compiler_params=pltpu.CompilerParams(
            dimension_semantics=("parallel", "parallel"),
            vmem_limit_bytes=_VMEM_LIMIT_BYTES,
        ),
    )(x2, x2)                                     # same array passed twice; halves picked by index_map

    return out2.reshape(out_shape)


if __name__ == "__main__":
    key = jax.random.PRNGKey(0)
    k1, k2, k3 = jax.random.split(key, 3)

    # 1) Common GLU layout: split along the last (hidden) dim, half width = 128.
    x1 = jax.random.normal(k1, (2, 8, 256), dtype=jnp.float32)
    y1 = jax.block_until_ready(glu(x1, dim=-1))
    a1, b1 = jnp.split(x1, 2, axis=-1)
    ref1 = a1 * jax.nn.sigmoid(b1)
    assert y1.shape == ref1.shape == (2, 8, 128)
    assert jnp.allclose(y1, ref1, atol=1e-5, rtol=1e-5)

    # 2) Channel split (dim=1) on an NCHW-style tensor; exercises the
    #    column-offset half selection with a tiny `pre` and >1 column blocks.
    x2 = jax.random.normal(k2, (2, 4, 16, 16), dtype=jnp.float32)
    y2 = jax.block_until_ready(glu(x2, dim=1))
    a2, b2 = jnp.split(x2, 2, axis=1)
    ref2 = a2 * jax.nn.sigmoid(b2)
    assert y2.shape == ref2.shape == (2, 2, 16, 16)
    assert jnp.allclose(y2, ref2, atol=1e-5, rtol=1e-5)

    # 3) bf16 (the common GLU/MLP dtype): 16-row sublane packing, f32 gate math.
    x3 = jax.random.normal(k3, (4, 32, 512), dtype=jnp.bfloat16)
    y3 = jax.block_until_ready(glu(x3, dim=-1))
    a3, b3 = jnp.split(x3.astype(jnp.float32), 2, axis=-1)
    ref3 = a3 * jax.nn.sigmoid(b3)
    assert y3.shape == ref3.shape == (4, 32, 256) and y3.dtype == jnp.bfloat16
    assert jnp.allclose(y3.astype(jnp.float32), ref3, atol=2e-2, rtol=2e-2)

    # 4) Lane-unaligned half width (H=8) -> plain-XLA fallback path, still correct.
    y4 = jax.block_until_ready(glu(x2, dim=-1))
    a4, b4 = jnp.split(x2, 2, axis=-1)
    ref4 = a4 * jax.nn.sigmoid(b4)
    assert y4.shape == (2, 4, 16, 8)
    assert jnp.allclose(y4, ref4, atol=1e-5, rtol=1e-5)

    print("KERNEL_OK")
</pallas_src>

<mosaic_0001>
module attributes {stable_mosaic.version = 11 : i64} {
  func.func @_glu_kernel(%arg0: i32, %arg1: i32, %arg2: memref<8x128xf32, #tpu.memory_space<vmem>>, %arg3: memref<8x128xf32, #tpu.memory_space<vmem>>, %arg4: memref<8x128xf32, #tpu.memory_space<vmem>>) attributes {dimension_semantics = [#tpu.dimension_semantics<parallel>, #tpu.dimension_semantics<parallel>], iteration_bounds = array<i64: 2, 1>, scalar_prefetch = 0 : i64, scratch_operands = 0 : i64, tpu.core_type = #tpu.core_type<tc>, window_params = [{transform_indices = @transform_0, window_bounds = array<i64: 8, 128>}, {transform_indices = @transform_1, window_bounds = array<i64: 8, 128>}, {transform_indices = @transform_2, window_bounds = array<i64: 8, 128>}]} {
    %c0 = arith.constant 0 : index
    %c0_0 = arith.constant 0 : index
    %0 = vector.load %arg2[%c0, %c0_0] : memref<8x128xf32, #tpu.memory_space<vmem>>, vector<8x128xf32>
    %c0_1 = arith.constant 0 : index
    %c0_2 = arith.constant 0 : index
    %1 = vector.load %arg3[%c0_1, %c0_2] : memref<8x128xf32, #tpu.memory_space<vmem>>, vector<8x128xf32>
    %cst = arith.constant 5.000000e-01 : f32
    %2 = vector.broadcast %cst : f32 to vector<8x128xf32>
    %3 = arith.mulf %2, %1 : vector<8x128xf32>
    %4 = math.tanh %3 : vector<8x128xf32>
    %cst_3 = arith.constant 5.000000e-01 : f32
    %5 = vector.broadcast %cst_3 : f32 to vector<8x128xf32>
    %6 = arith.mulf %5, %4 : vector<8x128xf32>
    %cst_4 = arith.constant 5.000000e-01 : f32
    %7 = vector.broadcast %cst_4 : f32 to vector<8x128xf32>
    %8 = arith.addf %6, %7 : vector<8x128xf32>
    %9 = arith.mulf %0, %8 : vector<8x128xf32>
    %c0_5 = arith.constant 0 : index
    %c0_6 = arith.constant 0 : index
    %10 = vector.load %arg4[%c0_5, %c0_6] : memref<8x128xf32, #tpu.memory_space<vmem>>, vector<8x128xf32>
    tpu.vector_store %arg4[%c0_5, %c0_6], %9 {strides = array<i32>} : memref<8x128xf32, #tpu.memory_space<vmem>>, vector<8x128xf32>,
    return
  }
  func.func @transform_0(%arg0: i32, %arg1: i32) -> (i32, i32) {
    %c0_i32 = arith.constant 0 : i32
    return %arg0, %arg1 : i32, i32
  }
  func.func @transform_1(%arg0: i32, %arg1: i32) -> (i32, i32) {
    %c1_i32 = arith.constant 1 : i32
    %0 = arith.addi %arg1, %c1_i32 : i32
    %c0_i32 = arith.constant 0 : i32
    return %arg0, %0 : i32, i32
  }
  func.func @transform_2(%arg0: i32, %arg1: i32) -> (i32, i32) {
    %c0_i32 = arith.constant 0 : i32
    return %arg0, %arg1 : i32, i32
  }
}

</mosaic_0001>

<bundles_post_ra>
// kernel: tpu_custom_call.1
= control target key start
LH: loop header
LB: loop body
LE: loop exit
PB: predicated region body
PF: predicated region fallthrough
CT: control target
= control target key end

     0   :  { %7 = vsyncpa [#allocation3], 0  ;;  %s746_s0 = inlined_call_operand.hbm [shape: f32[16,256], index: 0, kind: input, shape index: {}]   ;;  %s747_s1 = inlined_call_operand.hbm [shape: f32[16,256], index: 1, kind: input, shape index: {}]   ;;  %s748_s2 = inlined_call_operand.hbm [shape: f32[16,128], index: 2, kind: output, shape index: {}]  }
   0x1   :  { %9 = vsyncpa [#allocation3 + $0x1], 0 }
   0x2   :  { %10 = vsyncpa [#allocation6], 0 }
   0x3   :  { %12 = vsyncpa [#allocation6 + $0x1], 0 }
   0x4   :  { %13 = vsyncpa [#allocation4], 0 }
   0x5   :  { %15 = vsyncpa [#allocation4 + $0x1], 0  ;;  %s610_s9 = smov 0   ;;  %s612_s10 = smov 0  }
   0x6   :  { %s614_s11 = smov 0   ;;  %s616_s12 = smov 0  }
   0x7   :  { %s618_s13 = smov 0   ;;  %s620_s14 = smov 0  }
   0x8 LB: > { %s358_s15 = sadd.s32 4294967295, %s593_s14   ;;  %s359_s16 = sadd.s32 4294967294, %s593_s14   ;;  %s593_s14 = sphi %s620_s14, %s21_s14   ;;  %s589_s13 = sphi %s618_s13, %s758_s13   ;;  %s585_s12 = sphi %s616_s12, %s757_s12   ;;  %s581_s11 = sphi %s614_s11, %s756_s11   ;;  %s577_s10 = sphi %s612_s10, %s755_s10   ;;  %s573_s9 = sphi %s610_s9, %s754_s9  }
   0x9   : > { %s33_s17 = sadd.s32 1, %s589_s13  ;;  %s42_s18 = sadd.s32 1, %s581_s11 }
   0xa   : > { %p35_p0 = scmp.ge.s32.totalorder %s33_s17, 2  ;;  %p49_p1 = scmp.ne.s32.totalorder %s581_s11, %s577_s10 }
   0xb   : > { %p50_p2 = scmp.eq.s32.totalorder %s593_s14, 0  ;;  %p55_p3 = scmp.ne.s32.totalorder %s577_s10, %s573_s9 }
   0xc   : > { %s760_s17 = smov (%p35_p0, %s33_s17), 0  ;;  %p56_p5 = scmp.eq.s32.totalorder %s358_s15, 0 }
   0xd   : > { %p651_p4 = por %p50_p2, %p49_p1  ;;  %s37_s20 = ssub.s32 %s589_s13, %s760_s17 }
   0xe   : > { %p111_p6 = scmp.eq.s32.totalorder %s358_s15, 1  ;;  %p40_p7 = scmp.eq.s32.totalorder %s37_s20, 0 }
   0xf   : > { %p657_p8 = por %p56_p5, %p55_p3  ;;  %p117_p10 = scmp.eq.s32.totalorder %s359_s16, 1 }
  0x10   : > { %p661_p9 = por %p111_p6, %p49_p1  ;;  %p361_p12 = scmp.ge.s32.totalorder %s593_s14, 2 }
  0x11   : > { %s666_s23 = scalar_select %p40_p7, %s581_s11, %s42_s18  }
  0x12   : > { %p668_p11 = por %p117_p10, %p55_p3  ;;  %p395_p13 = scmp.lt.s32.totalorder %s593_s14, 2 }
  0x13   : > { %s137_s25 = sand.u32 1, %s581_s11   ;;  %s376_s27 = sshll.u32 %s589_s13, 4 }
  0x14   : > { %s362_s26 = sshll.u32 %s137_s25, 3  ;;  %s147_s30 = scalar_lea.hbm %s746_s0, %s376_s27 }
  0x15   : > { %s141_s3 = scalar_lea.vmem [#allocation2], %s362_s26  ;;  %s149_s5 = sshll.u32 %s147_s30, 4  ;;  %s150_s5 = int_to_ptr.hbm [resolvable:$true] %s149_s5 }
  0x16   : > { %s151_s4 = sshll.u32 %s141_s3, 4  ;;  %p681_p0 = pnand %p395_p13, %p651_p4  ;;  %s152_s4 = int_to_ptr.vmem [resolvable:$true] %s151_s4 }
  0x17   : > { %p368_p1 = scmp.ge.s32.totalorder %s593_s14, 1  ;;  %p178_p2 = scmp.lt.s32.totalorder %s593_s14, 3 }
  0x18   : > { %s138_s7 = scalar_lea.sflag [#allocation3], %s137_s25  ;;  %s291_s16 = scalar_lea.hbm %s747_s1, %s376_s27 }
  0x19   : > { %387 = dma.hbm_to_vmem [thread:$0]  (!%p681_p0), %s150_s5, 128, %s152_s4, %s138_s7  }
  0x1a   : > { %p179_p3 = pnand %p368_p1, %p178_p2  ;;  %s162_s18 = scalar_lea.vmem [#allocation5], %s362_s26 }
  0x1b   : > { %s173_s20 = sshll.u32 %s162_s18, 4  ;;  %s292_s28 = scalar_lea.hbm %s291_s16, 8  ;;  %s174_s20 = int_to_ptr.vmem [resolvable:$true] %s173_s20 }
  0x1c   : > { %s171_s19 = sshll.u32 %s292_s28, 4  ;;  %s159_s29 = scalar_lea.sflag [#allocation6], %s137_s25  ;;  %s172_s19 = int_to_ptr.hbm [resolvable:$true] %s171_s19 }
  0x1d   : > { %390 = dma.hbm_to_vmem [thread:$0]  (!%p681_p0), %s172_s19, 128, %s174_s20, %s159_s29  }
  0x1e   : > { %182 = sbr.rel (%p179_p3) target bundleno = 57 (0x39), region = 28  ;;  %s695_s30 = sand.u32 (!%p179_p3), 1, %s577_s10  }
  0x1f   : > { %s369_s3 = sshll.u32 (!%p179_p3), %s695_s30, 3  ;;  %s185_s4 = scalar_lea.sflag (!%p179_p3), [#allocation3], %s695_s30 }
  0x20   : > { %s188_s5 = scalar_lea.vmem (!%p179_p3), [#allocation2], %s369_s3 }
  0x23   : > { %560 = dma.done.wait (%p657_p8), %s185_s4, 128  }
  0x24   : > { %562 = vsyncadd (%p657_p8), %s185_s4, 4294967168  ;;  %s195_s25 = scalar_lea.sflag [#allocation6], %s695_s30  ;;  %s198_s26 = scalar_lea.vmem [#allocation5], %s369_s3 }
  0x25   : > { %564 = dma.done.wait (%p657_p8), %s195_s25, 128  }
  0x26   : > { %566 = vsyncadd (%p657_p8), %s195_s25, 4294967168  ;;  %v227_v0 = vld [vmem:[%s198_s26] sm:$0xff]  ;;  %s373_s27 = sshll.u32 %s585_s12, 3  ;;  %v226_v4 = vld [vmem:[%s188_s5] sm:$0xff]  ;;  %s224_s15 = scalar_lea.vmem [#allocation7], %s369_s3 }
  0x27   : > { %v228_v1 = vmul.f32 0.5, %v227_v0  ;;  %s246_s8 = scalar_lea.hbm %s748_s2, %s373_s27  ;;  %s248_s16 = sshll.u32 %s224_s15, 4  ;;  %s249_s16 = int_to_ptr.vmem [resolvable:$true] %s248_s16 }
  0x28   : > { %s250_s18 = sshll.u32 %s246_s8, 4  ;;  %s235_s21 = scalar_lea.sflag [#allocation4], %s695_s30  ;;  %s251_s18 = int_to_ptr.hbm [resolvable:$true] %s250_s18 }
  0x29   : > { %445 = vtanh.f32 %v228_v1  ;;  %s521_s20 = sshra.s32 %s251_s18, 4  ;;  %s527_s29 = scalar_lea.hbm %s748_s2, 16  ;;  %s522_s20 = int_to_ptr.hbm [resolvable:$true] %s521_s20 }
  0x2a   : > { %s523_s12 = scalar_lea.hbm %s522_s20, 8  ;;  %p528_p7 = scmp.lt.s32.totalorder %s522_s20, %s748_s2 }
  0x2b   : > { %p524_p4 = scmp.ne.s32.totalorder %s522_s20, %s523_s12  ;;  %p529_p8 = scmp.lt.s32.totalorder %s527_s29, %s523_s12 }
  0x2d   : > { %p525_p5 = pnand %p524_p4, %p661_p9  ;;  %p530_p10 = por %p529_p8, %p528_p7 }
  0x2f   : > { %v446_v2 = vpop.eup %445  ;;  %p526_p6 = pneg %p525_p5 }
  0x30   : > { %v230_v3 = vmul.f32 0.5, %v446_v2 }
  0x31   : > { %p531_p13 = pnand %p530_p10, %p526_p6 }
  0x32   : > { %v231_v5 = vadd.f32 0.5, %v230_v3 }
  0x34   : > { %v232_v6 = vmul.f32 %v231_v5, %v226_v4 }
  0x36   : > { %233 = vst [vmem:[%s224_s15] sm:$0xff] %v232_v6 }
  0x37   : > { %534 = shalt.err (!%p531_p13)
}
  0x38   : > { %382 = dma.vmem_to_hbm [thread:$0]  (%p661_p9), %s249_s16, 128, %s251_s18, %s235_s21  }
  0x39 PF: > { %s262_s30 = sand.u32 1, %s573_s9   ;;  %p392_p0 = pnand %p361_p12, %p668_p11 }
  0x3a   : > { %s263_s5 = scalar_lea.sflag [#allocation4], %s262_s30 }
  0x3b   : > { %p393_p1 = pneg %p392_p0 }
  0x3d   : > { %568 = dma.done.wait (%p393_p1), %s263_s5, 128  }
  0x3e   : > { %570 = vsyncadd (%p393_p1), %s263_s5, 4294967168  ;;  %s21_s14 = sadd.s32 1, %s593_s14   ;;  %s754_s9 = smov %s577_s10 }
  0x3f   : > { %p18_p2 = scmp.ge.s32.totalorder %s21_s14, 4   ;;  %s755_s10 = smov %s581_s11 }
  0x40   : > { %s756_s11 = smov %s666_s23  ;;  %s757_s12 = smov %s589_s13 }
  0x41   : > { %s758_s13 = smov %s760_s17  ;;  %20 = sbr.rel (!%p18_p2) target bundleno = 8 (0x8), region = 86 }
  0x46   :  { %269 = vsyncpa [#allocation3], 1 }
  0x47   :  { %271 = vsyncpa [#allocation3 + $0x1], 1 }
  0x48   :  { %272 = vsyncpa [#allocation6], 1 }
  0x49   :  { %274 = vsyncpa [#allocation6 + $0x1], 1 }
  0x4a   :  { %275 = vsyncpa [#allocation4], 1 }
  0x4b   :  { %277 = vsyncpa [#allocation4 + $0x1], 1 }

</bundles_post_ra>
